<compile_context>
chip_gen: v7x
topology: tpu7x:2x2x1
jax: 0.10.0
libtpu: 0.0.40
codegen_flags: <defaults>
</compile_context>

<pallas_src>
import jax
import jax.numpy as jnp
from jax.experimental import pallas as pl
from jax.experimental.pallas import tpu as pltpu


def _round_up(a, b):
    return ((a + b - 1) // b) * b


def _chip_config():
    """Per-TPU-generation tile sizes, VMEM budget and TensorCore count."""
    try:
        kind = jax.devices()[0].device_kind.lower().replace(" ", "")
    except Exception:
        kind = ""
    mib = 1024 * 1024
    if "v7" in kind or "tpu7" in kind:
        # v7x: 64 MiB physical VMEM per TC, 2 TCs/chip, 3.2 TB/s HBM.
        return dict(tm=512, tn=512, tk=1024, vmem=48 * mib, cores=2)
    if "v6" in kind:
        # v6e: 128 MiB VMEM, 1 TC/chip.
        return dict(tm=1024, tn=1024, tk=1024, vmem=96 * mib, cores=1)
    if "v5e" in kind or "v5lite" in kind:
        # v5e: 128 MiB VMEM, most DMA-exposed -> big tiles to hide HBM.
        return dict(tm=1024, tn=1024, tk=1024, vmem=96 * mib, cores=1)
    if "v5p" in kind or "v5" in kind or "v4" in kind:
        # Megacore chips (2 TCs), 128 MiB VMEM.
        return dict(tm=1024, tn=1024, tk=1024, vmem=96 * mib, cores=2)
    # Unknown / emulated backend: conservative but still well-sized tiles.
    return dict(tm=512, tn=512, tk=512, vmem=48 * mib, cores=1)


def _matmul_bias_kernel(x_ref, w_ref, b_ref, o_ref, acc_ref):
    # x_ref: (tm, tk), w_ref: (tk, tn), b_ref: (1, tn),
    # o_ref: (tm, tn), acc_ref: (tm, tn) f32 scratch.
    k = pl.program_id(2)
    nk = pl.num_programs(2)

    p = jnp.dot(x_ref[...], w_ref[...], preferred_element_type=jnp.float32)

    @pl.when(k == 0)
    def _():
        acc_ref[...] = jnp.zeros_like(acc_ref)

    @pl.when(k != nk - 1)
    def _():
        acc_ref[...] += p

    @pl.when(k == nk - 1)
    def _():
        # Fold the last partial product straight into the output write; no
        # redundant accumulator writeback + reload on the final K step.
        o_ref[...] = (
            acc_ref[...] + p + b_ref[...].astype(jnp.float32)
        ).astype(o_ref.dtype)


def linear(x, weight, bias, *, tm=None, tn=None, tk=None):
    """x: (..., K); weight: (K, N); bias: (N,) -> (..., N)."""
    *lead, K = x.shape
    Kw, N = weight.shape
    assert K == Kw, f"contraction mismatch: {K} vs {Kw}"
    assert bias.shape == (N,)

    M = 1
    for d in lead:
        M *= d
    x2 = x.reshape(M, K)
    b2 = bias.reshape(1, N)

    cfg = _chip_config()
    tm = cfg["tm"] if tm is None else tm
    tn = cfg["tn"] if tn is None else tn
    tk = cfg["tk"] if tk is None else tk

    # Clamp tiles for small problems while keeping TPU tiling legality
    # (sublane dims multiples of 8, lane dims multiples of 128).
    tm = min(tm, _round_up(M, 8))
    tn = min(tn, _round_up(N, 128))

    # On 2-TC chips, make sure both cores get work: if the parallel grid
    # collapses to one block (small-M decode shapes), split the N axis.
    while (
        cfg["cores"] >= 2
        and pl.cdiv(M, tm) * pl.cdiv(N, tn) < cfg["cores"]
        and tn > 128
    ):
        tn = _round_up(tn // 2, 128)

    # K is the reduction axis, so edge-block garbage there would corrupt the
    # sum: either a single K block covers K exactly, or K is zero-padded to a
    # multiple of tk (tk rebalanced so padding stays < 128 per step).
    if K <= tk:
        tk, Kp = K, K
    else:
        nks = pl.cdiv(K, tk)
        tk = _round_up(pl.cdiv(K, nks), 128)
        Kp = tk * nks

    xp = x2 if Kp == K else jnp.pad(x2, ((0, 0), (0, Kp - K)))
    wp = weight if Kp == K else jnp.pad(weight, ((0, Kp - K), (0, 0)))

    grid = (pl.cdiv(M, tm), pl.cdiv(N, tn), Kp // tk)

    # Advisory cost: x is re-read once per N tile, weight once per M tile,
    # output written once.
    cost = pl.CostEstimate(
        flops=2 * M * N * Kp,
        transcendentals=0,
        bytes_accessed=(
            M * Kp * jnp.dtype(x.dtype).itemsize * grid[1]
            + Kp * N * jnp.dtype(weight.dtype).itemsize * grid[0]
            + N * jnp.dtype(bias.dtype).itemsize * grid[0]
            + M * N * jnp.dtype(x.dtype).itemsize
        ),
    )

    out = pl.pallas_call(
        _matmul_bias_kernel,
        out_shape=jax.ShapeDtypeStruct((M, N), x.dtype),
        grid_spec=pltpu.PrefetchScalarGridSpec(
            num_scalar_prefetch=0,
            grid=grid,
            in_specs=[
                pl.BlockSpec((tm, tk), lambda i, j, k: (i, k)),  # x tile
                pl.BlockSpec((tk, tn), lambda i, j, k: (k, j)),  # weight tile
                pl.BlockSpec((1, tn), lambda i, j, k: (0, j)),   # bias row
            ],
            out_specs=pl.BlockSpec((tm, tn), lambda i, j, k: (i, j)),
            scratch_shapes=[pltpu.VMEM((tm, tn), jnp.float32)],
        ),
        compiler_params=pltpu.CompilerParams(
            dimension_semantics=("parallel", "parallel", "arbitrary"),
            vmem_limit_bytes=cfg["vmem"],
        ),
        cost_estimate=cost,
    )(xp, wp, b2)

    return out.reshape(*lead, N)


if __name__ == "__main__":
    # Small shapes consistent with the module: batch=2, seq=8, in=32, out=64.
    B, S, D, N = 2, 8, 32, 64

    key = jax.random.PRNGKey(0)
    kx, kw = jax.random.split(key)

    x = jax.random.normal(kx, (B, S, D), dtype=jnp.float32)
    weight = jax.random.normal(kw, (D, N), dtype=jnp.float32)  # ~ torch.randn
    bias = jnp.zeros((N,), dtype=jnp.float32)                  # ~ torch.zeros

    out = linear(x, weight, bias)
    out = jax.block_until_ready(out)

    # Reference check (plain JAX, same semantics as torch.matmul + bias).
    ref = jnp.matmul(x, weight) + bias
    assert out.shape == (B, S, N)
    assert jnp.allclose(out, ref, atol=1e-4, rtol=1e-4)

    print("KERNEL_OK")
</pallas_src>

<mosaic_0001>
module attributes {stable_mosaic.version = 11 : i64} {
  func.func @_matmul_bias_kernel(%arg0: i32, %arg1: i32, %arg2: i32, %arg3: memref<16x32xf32, #tpu.memory_space<vmem>>, %arg4: memref<32x128xf32, #tpu.memory_space<vmem>>, %arg5: memref<1x128xf32, #tpu.memory_space<vmem>>, %arg6: memref<16x128xf32, #tpu.memory_space<vmem>>, %arg7: memref<16x128xf32, #tpu.memory_space<vmem>>) attributes {dimension_semantics = [#tpu.dimension_semantics<parallel>, #tpu.dimension_semantics<parallel>, #tpu.dimension_semantics<arbitrary>], iteration_bounds = array<i64: 1, 1, 1>, scalar_prefetch = 0 : i64, scratch_operands = 1 : i64, tpu.core_type = #tpu.core_type<tc>, window_params = [{transform_indices = @transform_0, window_bounds = array<i64: 16, 32>}, {transform_indices = @transform_1, window_bounds = array<i64: 32, 128>}, {transform_indices = @transform_2, window_bounds = array<i64: 1, 128>}, {transform_indices = @transform_3, window_bounds = array<i64: 16, 128>}]} {
    %c0 = arith.constant 0 : index
    %c0_0 = arith.constant 0 : index
    %0 = vector.load %arg3[%c0, %c0_0] : memref<16x32xf32, #tpu.memory_space<vmem>>, vector<16x32xf32>
    %c0_1 = arith.constant 0 : index
    %c0_2 = arith.constant 0 : index
    %1 = vector.load %arg4[%c0_1, %c0_2] : memref<32x128xf32, #tpu.memory_space<vmem>>, vector<32x128xf32>
    %cst = arith.constant dense<0.000000e+00> : vector<16x128xf32>
    %2 = tpu.matmul %0, %1, %cst {dimension_numbers = #tpu.dot_dimension_numbers<[1], [0], [0], [1], [0, 0, 1, 1], [], []>} : vector<16x32xf32>, vector<32x128xf32>, vector<16x128xf32> -> vector<16x128xf32>
    %c0_i32 = arith.constant 0 : i32
    %3 = arith.cmpi eq, %arg2, %c0_i32 : i32
    %4 = arith.extui %3 : i1 to i32
    %c0_i32_3 = arith.constant 0 : i32
    %5 = arith.cmpi ne, %4, %c0_i32_3 : i32
    scf.if %5 {
      %cst_8 = arith.constant 0.000000e+00 : f32
      %12 = vector.broadcast %cst_8 : f32 to vector<16x128xf32>
      %c0_9 = arith.constant 0 : index
      %c0_10 = arith.constant 0 : index
      %13 = vector.load %arg7[%c0_9, %c0_10] : memref<16x128xf32, #tpu.memory_space<vmem>>, vector<16x128xf32>
      tpu.vector_store %arg7[%c0_9, %c0_10], %12 {strides = array<i32>} : memref<16x128xf32, #tpu.memory_space<vmem>>, vector<16x128xf32>,
    } else {
    }
    %c0_i32_4 = arith.constant 0 : i32
    %6 = arith.cmpi ne, %arg2, %c0_i32_4 : i32
    %7 = arith.extui %6 : i1 to i32
    %c0_i32_5 = arith.constant 0 : i32
    %8 = arith.cmpi ne, %7, %c0_i32_5 : i32
    scf.if %8 {
      %c0_8 = arith.constant 0 : index
      %c0_9 = arith.constant 0 : index
      %12 = vector.load %arg7[%c0_8, %c0_9] : memref<16x128xf32, #tpu.memory_space<vmem>>, vector<16x128xf32>
      %13 = arith.addf %12, %2 : vector<16x128xf32>
      %c0_10 = arith.constant 0 : index
      %c0_11 = arith.constant 0 : index
      %14 = vector.load %arg7[%c0_10, %c0_11] : memref<16x128xf32, #tpu.memory_space<vmem>>, vector<16x128xf32>
      tpu.vector_store %arg7[%c0_10, %c0_11], %13 {strides = array<i32>} : memref<16x128xf32, #tpu.memory_space<vmem>>, vector<16x128xf32>,
    } else {
    }
    %c0_i32_6 = arith.constant 0 : i32
    %9 = arith.cmpi eq, %arg2, %c0_i32_6 : i32
    %10 = arith.extui %9 : i1 to i32
    %c0_i32_7 = arith.constant 0 : i32
    %11 = arith.cmpi ne, %10, %c0_i32_7 : i32
    scf.if %11 {
      %c0_8 = arith.constant 0 : index
      %c0_9 = arith.constant 0 : index
      %12 = vector.load %arg7[%c0_8, %c0_9] : memref<16x128xf32, #tpu.memory_space<vmem>>, vector<16x128xf32>
      %13 = arith.addf %12, %2 : vector<16x128xf32>
      %c0_10 = arith.constant 0 : index
      %c0_11 = arith.constant 0 : index
      %14 = vector.load %arg5[%c0_10, %c0_11] : memref<1x128xf32, #tpu.memory_space<vmem>>, vector<1x128xf32>
      %15 = vector.broadcast %14 : vector<1x128xf32> to vector<16x128xf32>
      %16 = arith.addf %13, %15 : vector<16x128xf32>
      %c0_12 = arith.constant 0 : index
      %c0_13 = arith.constant 0 : index
      %17 = vector.load %arg6[%c0_12, %c0_13] : memref<16x128xf32, #tpu.memory_space<vmem>>, vector<16x128xf32>
      tpu.vector_store %arg6[%c0_12, %c0_13], %16 {strides = array<i32>} : memref<16x128xf32, #tpu.memory_space<vmem>>, vector<16x128xf32>,
    } else {
    }
    return
  }
  func.func @transform_0(%arg0: i32, %arg1: i32, %arg2: i32) -> (i32, i32) {
    %c0_i32 = arith.constant 0 : i32
    return %arg0, %arg2 : i32, i32
  }
  func.func @transform_1(%arg0: i32, %arg1: i32, %arg2: i32) -> (i32, i32) {
    %c0_i32 = arith.constant 0 : i32
    return %arg2, %arg1 : i32, i32
  }
  func.func @transform_2(%arg0: i32, %arg1: i32, %arg2: i32) -> (i32, i32) {
    %c0_i32 = arith.constant 0 : i32
    %c0_i32_0 = arith.constant 0 : i32
    return %c0_i32, %arg1 : i32, i32
  }
  func.func @transform_3(%arg0: i32, %arg1: i32, %arg2: i32) -> (i32, i32) {
    %c0_i32 = arith.constant 0 : i32
    return %arg0, %arg1 : i32, i32
  }
}

</mosaic_0001>

<bundles_post_ra>
// kernel: tpu_custom_call.1
= control target key start
LH: loop header
LB: loop body
LE: loop exit
PB: predicated region body
PF: predicated region fallthrough
CT: control target
= control target key end

     0   :  { %8 = vsyncpa [#allocation4], 0  ;;  %s361_s0 = inlined_call_operand.hbm [shape: f32[16,32], index: 0, kind: input, shape index: {}]   ;;  %s362_s1 = inlined_call_operand.hbm [shape: f32[32,64], index: 1, kind: input, shape index: {}]   ;;  %s363_s2 = inlined_call_operand.vmem [shape: f32[1,64], index: 2, kind: input, shape index: {}]   ;;  %s364_s3 = inlined_call_operand.hbm [shape: f32[16,64], index: 3, kind: output, shape index: {}]  }
   0x1   :  { %9 = vsyncpa [#allocation7], 0 }
   0x2   :  { %10 = vsyncpa [#allocation5], 0  ;;  %s288_s12 = smov [#allocation3]   ;;  %s216_s16 = scalar_lea.hbm %s361_s0, 256 }
   0x3   :  { %s16_s13 = sshll.u32 %s288_s12, 4  ;;  %p217_p0 = scmp.ne.s32.totalorder %s361_s0, %s216_s16  ;;  %s17_s13 = int_to_ptr.vmem [resolvable:$true] %s16_s13 }
   0x4   :  { %p220_p1 = scmp.lt.u32.totalorder %s216_s16, %s361_s0 }
   0x6   :  { %p222_p2 = pnand %p220_p1, %p217_p0 }
   0x8   :  { %225 = shalt.err (!%p222_p2)
}
   0x9   :  { %s226_s21 = scalar_lea.vmem %s17_s13, 256  ;;  %p231_p4 = scmp.lt.s32.totalorder %s17_s13, %s17_s13 }
   0xa   :  { %p227_p3 = scmp.ne.s32.totalorder %s17_s13, %s226_s21  ;;  %p232_p5 = scmp.lt.s32.totalorder %s226_s21, %s226_s21 }
   0xc   :  { %p233_p6 = por %p232_p5, %p231_p4 }
   0xe   :  { %p234_p7 = pnand %p233_p6, %p227_p3 }
  0x10   :  { %237 = shalt.err (!%p234_p7)
}
  0x11   :  { %s289_s22 = smov 128   ;;  %s290_s23 = smov 8  }
  0x12   :  { %22 = dma.hbm_to_vmem [thread:$0]  %s361_s0, 256, %s17_s13, [#allocation4], %s289_s22, %s289_s22, %s290_s23  }
  0x13   :  { %s291_s26 = smov [#allocation6]   ;;  %s238_s30 = scalar_lea.hbm %s362_s1, 512 }
  0x14   :  { %s28_s27 = sshll.u32 %s291_s26, 4  ;;  %p239_p8 = scmp.ne.s32.totalorder %s362_s1, %s238_s30  ;;  %s29_s27 = int_to_ptr.vmem [resolvable:$true] %s28_s27 }
  0x15   :  { %p242_p9 = scmp.lt.u32.totalorder %s238_s30, %s362_s1 }
  0x17   :  { %p244_p10 = pnand %p242_p9, %p239_p8 }
  0x19   :  { %247 = shalt.err (!%p244_p10)
}
  0x1a   :  { %s248_s8 = scalar_lea.vmem %s29_s27, 512  ;;  %p253_p12 = scmp.lt.s32.totalorder %s29_s27, %s29_s27 }
  0x1b   :  { %p249_p11 = scmp.ne.s32.totalorder %s29_s27, %s248_s8  ;;  %p254_p13 = scmp.lt.s32.totalorder %s248_s8, %s248_s8 }
  0x1d   :  { %p255_p0 = por %p254_p13, %p253_p12 }
  0x1f   :  { %p256_p1 = pnand %p255_p0, %p249_p11 }
  0x21   :  { %259 = shalt.err (!%p256_p1)
}
  0x22   :  { %34 = dma.hbm_to_vmem [thread:$0]  %s362_s1, 512, %s29_s27, [#allocation7], %s289_s22, %s289_s22, %s290_s23  }
  0x23   :  { %282 = dma.done.wait [#allocation4], 256  }
  0x24   :  { %283 = vsyncadd [#allocation4], 4294967040 }
  0x25   :  { %284 = dma.done.wait [#allocation7], 512  }
  0x26   :  { %285 = vsyncadd [#allocation7], 4294966784  ;;  %vm49_vm0 = vcmask 261120   ;;  %v45_v0 = vld [vmem:[#allocation6] sm:$0xff]  ;;  %v46_v1 = vld [vmem:[#allocation6 + $0x8] sm:$0xff]  ;;  %s292_s11 = smov [#allocation8]  }
  0x27   :  { %v47_v2 = vld [vmem:[#allocation6 + $0x10] sm:$0xff]  ;;  %v203_v3 = vpack.c.bf16 %v46_v1, %v45_v0  ;;  %v48_v4 = vld [vmem:[#allocation6 + $0x18] sm:$0xff]  ;;  %s170_s12 = sshll.u32 %s292_s11, 4  ;;  %s171_s12 = int_to_ptr.vmem [resolvable:$true] %s170_s12 }
  0x28   :  { %v43_v5 = vld [vmem:[#allocation3] sm:$0xff]  ;;  %v207_v6 = vpack.c.bf16 %v48_v4, %v47_v2  ;;  %v44_v7 = vld [vmem:[#allocation3 + $0x8] sm:$0xff]  ;;  %s260_s13 = scalar_lea.vmem %s171_s12, 256  ;;  %p265_p3 = scmp.lt.s32.totalorder %s171_s12, %s171_s12 }
  0x29   :  { %200 = vmatprep.mubr.msk.f32.mxu0 %vm49_vm0, %v43_v5  ;;  %204 = vmatprep.subr.bf16.mxu0 %v203_v3  ;;  %v185_v8 = vld [vmem:[%s363_s2] ss:$0 sm:$0xff]  ;;  %p261_p2 = scmp.ne.s32.totalorder %s171_s12, %s260_s13  ;;  %p266_p4 = scmp.lt.s32.totalorder %s260_s13, %s260_s13 }
  0x2a   :  { %206 = vmatpush3.bf16.msra.mxu0 %v203_v3 }
  0x2b   :  { %208 = vmatprep.subr.bf16.mxu0 %v207_v6  ;;  %p267_p5 = por %p266_p4, %p265_p3 }
  0x2d   :  { %p268_p6 = pnand %p267_p5, %p261_p2 }
  0x2e   :  { %210 = vmatpush3.bf16.msra.mxu0 %v207_v6 }
  0x31   :  { %201 = vmatmul.mubr.msk.f32.vlgmr.msra.gmra.mrb[0].mxu0 %vm49_vm0, %v44_v7 }
 0x104   :  { %v202_v9 = vpop.f32.mrb[0].mxu0 }
 0x105   :  { %v162_v10 = vadd.f32 %v202_v9, %v185_v8  ;;  %v122_v11 = vpop.f32.mrb[1].mxu0 }
 0x106   :  { %v161_v12 = vadd.f32 %v185_v8, %v122_v11 }
 0x107   :  { %164 = vst [vmem:[#allocation8 + $0x8] sm:$0xff] %v162_v10 }
 0x108   :  { %163 = vst [vmem:[#allocation8] sm:$0xff] %v161_v12 }
 0x109   :  { %271 = shalt.err (!%p268_p6)
}
 0x10a   :  { %s272_s2 = scalar_lea.hbm %s364_s3, 256 }
 0x10b   :  { %p273_p7 = scmp.ne.s32.totalorder %s364_s3, %s272_s2  ;;  %p276_p8 = scmp.lt.u32.totalorder %s272_s2, %s364_s3 }
 0x10d   :  { %p278_p9 = pnand %p276_p8, %p273_p7 }
 0x10f   :  { %281 = shalt.err (!%p278_p9)
}
 0x110   :  { %176 = dma.vmem_to_hbm [thread:$0]  %s171_s12, 256, %s364_s3, [#allocation5], %s289_s22, %s289_s22, %s290_s23  }
 0x111   :  { %286 = dma.done.wait [#allocation5], 256  }
 0x112   :  { %287 = vsyncadd [#allocation5], 4294967040 }
 0x113   :  { %180 = vsyncpa [#allocation4], 1 }
 0x114   :  { %181 = vsyncpa [#allocation7], 1 }
 0x115   :  { %182 = vsyncpa [#allocation5], 1 }

</bundles_post_ra>
